<compile_context>
chip_gen: v6e
topology: v6e:2x2x1
jax: 0.10.0
libtpu: 0.0.40
codegen_flags: <defaults>
</compile_context>

<pallas_src>
import math
from functools import partial

import jax
import jax.numpy as jnp
from jax.experimental import pallas as pl
from jax.experimental.pallas import tpu as pltpu

INPUT_DIMS = 3
PROJ_DIMS = 128
HIDDEN_DIMS = 2 * PROJ_DIMS
NEG_SLOPE = 0.01  # torch.nn.LeakyReLU default negative_slope


def _round_up(n, m):
    return ((n + m - 1) // m) * m


def _projection_kernel(x_ref, w1_ref, b1_ref, w2_ref, b2_ref, o_ref, *, mm_dtype):
    # x_ref:  (tm, 3)      w1_ref: (3, 256)    b1_ref: (1, 256)
    # w2_ref: (256, 128)   b2_ref: (1, 128)    o_ref:  (tm, 128)
    x = x_ref[...]
    w1 = w1_ref[...]

    # Layer 1 on the VPU: K=3 is a poor MXU fit (would pad to a full K-pass),
    # so do 3 broadcast multiply-adds; they occupy VALU slots that overlap
    # with the MXU work of layer 2.
    h = b1_ref[...] + x[:, 0:1] * w1[0:1, :]
    h = h + x[:, 1:2] * w1[1:2, :]
    h = h + x[:, 2:3] * w1[2:3, :]

    # LeakyReLU (VPU).
    h = jnp.where(h > 0, h, NEG_SLOPE * h)

    # Layer 2 on the MXU: (tm, 256) @ (256, 128), f32 accumulation.
    out = jnp.dot(h.astype(mm_dtype), w2_ref[...].astype(mm_dtype),
                  preferred_element_type=jnp.float32) + b2_ref[...]
    o_ref[...] = out.astype(o_ref.dtype)


def projection_layer(x, w1, b1, w2, b2, *, tm=1024, proj_=True,
                     mm_dtype=jnp.float32):
    """Pallas implementation of ProjectionLayer.forward.

    x: (..., INPUT_DIMS) float32. Returns (..., PROJ_DIMS) in x.dtype.
    mm_dtype: operand dtype of the second matmul (jnp.bfloat16 for extra
    MXU/HBM headroom if downstream tolerates it; f32 default is exact).
    """
    if not proj_:
        return x

    lead_shape = x.shape[:-1]
    m = int(math.prod(lead_shape)) if lead_shape else 1
    x2 = x.reshape(m, INPUT_DIMS)

    if tm % 8 != 0:
        raise ValueError(f"tm must be a multiple of 8 (f32 (8,128) tiling), got {tm}")

    # Cap the row tile for small inputs (keep it a multiple of 8). When there
    # is enough work, keep >= 2 grid steps so the 'parallel' axis can split
    # across the two TensorCores on v7x.
    tm_eff = min(tm, _round_up(m, 8))
    if m >= 512 and pl.cdiv(m, tm_eff) < 2:
        tm_eff = _round_up(pl.cdiv(m, 2), 8)

    grid = (pl.cdiv(m, tm_eff),)

    b1_2d = b1.reshape(1, HIDDEN_DIMS)
    b2_2d = b2.reshape(1, PROJ_DIMS)

    itemsize = jnp.dtype(x.dtype).itemsize
    cost = pl.CostEstimate(
        flops=2 * m * (INPUT_DIMS * HIDDEN_DIMS + HIDDEN_DIMS * PROJ_DIMS),
        transcendentals=0,
        bytes_accessed=(m * (INPUT_DIMS + PROJ_DIMS) * itemsize
                        + (INPUT_DIMS * HIDDEN_DIMS + HIDDEN_DIMS
                           + HIDDEN_DIMS * PROJ_DIMS + PROJ_DIMS) * 4),
    )

    out = pl.pallas_call(
        partial(_projection_kernel, mm_dtype=mm_dtype),
        out_shape=jax.ShapeDtypeStruct((m, PROJ_DIMS), x.dtype),
        grid_spec=pl.GridSpec(
            grid=grid,
            in_specs=[
                pl.BlockSpec((tm_eff, INPUT_DIMS), lambda i: (i, 0)),
                pl.BlockSpec((INPUT_DIMS, HIDDEN_DIMS), lambda i: (0, 0)),
                pl.BlockSpec((1, HIDDEN_DIMS), lambda i: (0, 0)),
                pl.BlockSpec((HIDDEN_DIMS, PROJ_DIMS), lambda i: (0, 0)),
                pl.BlockSpec((1, PROJ_DIMS), lambda i: (0, 0)),
            ],
            out_specs=pl.BlockSpec((tm_eff, PROJ_DIMS), lambda i: (i, 0)),
        ),
        compiler_params=pltpu.CompilerParams(
            dimension_semantics=("parallel",)),
        cost_estimate=cost,
    )(x2, w1, b1_2d, w2, b2_2d)

    return out.reshape(*lead_shape, PROJ_DIMS)


def init_params(key):
    """Deterministic init matching torch.nn.Linear default U(-1/sqrt(fan_in), +)."""
    k1, k2, k3, k4 = jax.random.split(key, 4)
    bound1 = 1.0 / math.sqrt(INPUT_DIMS)
    bound2 = 1.0 / math.sqrt(HIDDEN_DIMS)
    # Stored as (in, out): kernel computes x @ W (torch stores (out, in) and
    # computes x @ W.T — numerically equivalent layout choice).
    w1 = jax.random.uniform(k1, (INPUT_DIMS, HIDDEN_DIMS), jnp.float32,
                            -bound1, bound1)
    b1 = jax.random.uniform(k2, (HIDDEN_DIMS,), jnp.float32, -bound1, bound1)
    w2 = jax.random.uniform(k3, (HIDDEN_DIMS, PROJ_DIMS), jnp.float32,
                            -bound2, bound2)
    b2 = jax.random.uniform(k4, (PROJ_DIMS,), jnp.float32, -bound2, bound2)
    return w1, b1, w2, b2


def reference(x, w1, b1, w2, b2):
    # Ground truth at explicit highest precision (XLA's DEFAULT f32 matmul on
    # TPU may use reduced-precision MXU passes).
    hi = jax.lax.Precision.HIGHEST
    h = jnp.dot(x, w1, precision=hi) + b1
    h = jnp.where(h > 0, h, NEG_SLOPE * h)
    return jnp.dot(h, w2, precision=hi) + b2


if __name__ == "__main__":
    key = jax.random.PRNGKey(0)
    kx, kx2, kp = jax.random.split(key, 3)
    w1, b1, w2, b2 = init_params(kp)

    # Tolerance note: the in-kernel f32 MXU matmul may be lowered as bf16
    # passes depending on backend defaults; 1e-2 comfortably covers that while
    # still catching real bugs (layout / masking / bias errors are O(0.1..1)).
    TOL = 1e-2

    # 1) Small point-cloud-style input: (batch=2, n_points=8, input_dims=3).
    x = jax.random.normal(kx, (2, 8, INPUT_DIMS), dtype=jnp.float32)
    out = jax.block_until_ready(projection_layer(x, w1, b1, w2, b2))
    assert out.shape == (2, 8, PROJ_DIMS), out.shape
    ref = reference(x, w1, b1, w2, b2)
    assert jnp.allclose(out, ref, atol=TOL, rtol=TOL), \
        float(jnp.max(jnp.abs(out - ref)))

    # 2) Non-divisible row count with a multi-step grid: exercises the
    #    pad/slice-free path (partial last block handled by Pallas masking).
    xb = jax.random.normal(kx2, (3, 50, INPUT_DIMS), dtype=jnp.float32)  # m=150
    outb = jax.block_until_ready(projection_layer(xb, w1, b1, w2, b2, tm=64))
    assert outb.shape == (3, 50, PROJ_DIMS), outb.shape
    refb = reference(xb, w1, b1, w2, b2)
    assert jnp.allclose(outb, refb, atol=TOL, rtol=TOL), \
        float(jnp.max(jnp.abs(outb - refb)))

    print("KERNEL_OK")
</pallas_src>

<mosaic_0001>
module attributes {stable_mosaic.version = 11 : i64} {
  func.func @_projection_kernel(%arg0: i32, %arg1: memref<16x3xf32, #tpu.memory_space<vmem>>, %arg2: memref<3x256xf32, #tpu.memory_space<vmem>>, %arg3: memref<1x256xf32, #tpu.memory_space<vmem>>, %arg4: memref<256x128xf32, #tpu.memory_space<vmem>>, %arg5: memref<1x128xf32, #tpu.memory_space<vmem>>, %arg6: memref<16x128xf32, #tpu.memory_space<vmem>>) attributes {dimension_semantics = [#tpu.dimension_semantics<parallel>], iteration_bounds = array<i64: 1>, scalar_prefetch = 0 : i64, scratch_operands = 0 : i64, tpu.core_type = #tpu.core_type<tc>, window_params = [{transform_indices = @transform_0, window_bounds = array<i64: 16, 3>}, {pipeline_mode = #tpu.pipeline_mode<synchronous>, transform_indices = @transform_1, window_bounds = array<i64: 3, 256>}, {pipeline_mode = #tpu.pipeline_mode<synchronous>, transform_indices = @transform_2, window_bounds = array<i64: 1, 256>}, {pipeline_mode = #tpu.pipeline_mode<synchronous>, transform_indices = @transform_3, window_bounds = array<i64: 256, 128>}, {pipeline_mode = #tpu.pipeline_mode<synchronous>, transform_indices = @transform_4, window_bounds = array<i64: 1, 128>}, {transform_indices = @transform_5, window_bounds = array<i64: 16, 128>}]} {
    %c0 = arith.constant 0 : index
    %c0_0 = arith.constant 0 : index
    %0 = vector.load %arg1[%c0, %c0_0] : memref<16x3xf32, #tpu.memory_space<vmem>>, vector<16x3xf32>
    %c0_1 = arith.constant 0 : index
    %c0_2 = arith.constant 0 : index
    %1 = vector.load %arg2[%c0_1, %c0_2] : memref<3x256xf32, #tpu.memory_space<vmem>>, vector<3x256xf32>
    %c0_3 = arith.constant 0 : index
    %c0_4 = arith.constant 0 : index
    %2 = vector.load %arg3[%c0_3, %c0_4] : memref<1x256xf32, #tpu.memory_space<vmem>>, vector<1x256xf32>
    %3 = vector.extract_strided_slice %0 {offsets = [0, 0], sizes = [16, 1], strides = [1, 1]} : vector<16x3xf32> to vector<16x1xf32>
    %4 = vector.extract_strided_slice %1 {offsets = [0, 0], sizes = [1, 256], strides = [1, 1]} : vector<3x256xf32> to vector<1x256xf32>
    %5 = vector.broadcast %3 : vector<16x1xf32> to vector<16x256xf32>
    %6 = vector.broadcast %4 : vector<1x256xf32> to vector<16x256xf32>
    %7 = arith.mulf %5, %6 : vector<16x256xf32>
    %8 = vector.broadcast %2 : vector<1x256xf32> to vector<16x256xf32>
    %9 = arith.addf %8, %7 : vector<16x256xf32>
    %10 = vector.extract_strided_slice %0 {offsets = [0, 1], sizes = [16, 1], strides = [1, 1]} : vector<16x3xf32> to vector<16x1xf32>
    %11 = vector.extract_strided_slice %1 {offsets = [1, 0], sizes = [1, 256], strides = [1, 1]} : vector<3x256xf32> to vector<1x256xf32>
    %12 = vector.broadcast %10 : vector<16x1xf32> to vector<16x256xf32>
    %13 = vector.broadcast %11 : vector<1x256xf32> to vector<16x256xf32>
    %14 = arith.mulf %12, %13 : vector<16x256xf32>
    %15 = arith.addf %9, %14 : vector<16x256xf32>
    %16 = vector.extract_strided_slice %0 {offsets = [0, 2], sizes = [16, 1], strides = [1, 1]} : vector<16x3xf32> to vector<16x1xf32>
    %17 = vector.extract_strided_slice %1 {offsets = [2, 0], sizes = [1, 256], strides = [1, 1]} : vector<3x256xf32> to vector<1x256xf32>
    %18 = vector.broadcast %16 : vector<16x1xf32> to vector<16x256xf32>
    %19 = vector.broadcast %17 : vector<1x256xf32> to vector<16x256xf32>
    %20 = arith.mulf %18, %19 : vector<16x256xf32>
    %21 = arith.addf %15, %20 : vector<16x256xf32>
    %cst = arith.constant 0.000000e+00 : f32
    %22 = vector.broadcast %cst : f32 to vector<16x256xf32>
    %23 = arith.cmpf ogt, %21, %22 : vector<16x256xf32>
    %cst_5 = arith.constant 0.00999999977 : f32
    %24 = vector.broadcast %cst_5 : f32 to vector<16x256xf32>
    %25 = arith.mulf %24, %21 : vector<16x256xf32>
    %26 = arith.select %23, %21, %25 : vector<16x256xi1>, vector<16x256xf32>
    %c0_6 = arith.constant 0 : index
    %c0_7 = arith.constant 0 : index
    %27 = vector.load %arg4[%c0_6, %c0_7] : memref<256x128xf32, #tpu.memory_space<vmem>>, vector<256x128xf32>
    %cst_8 = arith.constant dense<0.000000e+00> : vector<16x128xf32>
    %28 = tpu.matmul %26, %27, %cst_8 {dimension_numbers = #tpu.dot_dimension_numbers<[1], [0], [0], [1], [0, 0, 1, 1], [], []>} : vector<16x256xf32>, vector<256x128xf32>, vector<16x128xf32> -> vector<16x128xf32>
    %c0_9 = arith.constant 0 : index
    %c0_10 = arith.constant 0 : index
    %29 = vector.load %arg5[%c0_9, %c0_10] : memref<1x128xf32, #tpu.memory_space<vmem>>, vector<1x128xf32>
    %30 = vector.broadcast %29 : vector<1x128xf32> to vector<16x128xf32>
    %31 = arith.addf %28, %30 : vector<16x128xf32>
    %c0_11 = arith.constant 0 : index
    %c0_12 = arith.constant 0 : index
    %32 = vector.load %arg6[%c0_11, %c0_12] : memref<16x128xf32, #tpu.memory_space<vmem>>, vector<16x128xf32>
    tpu.vector_store %arg6[%c0_11, %c0_12], %31 {strides = array<i32>} : memref<16x128xf32, #tpu.memory_space<vmem>>, vector<16x128xf32>,
    return
  }
  func.func @transform_0(%arg0: i32) -> (i32, i32) {
    %c0_i32 = arith.constant 0 : i32
    %c0_i32_0 = arith.constant 0 : i32
    return %arg0, %c0_i32 : i32, i32
  }
  func.func @transform_1(%arg0: i32) -> (i32, i32) {
    %c0_i32 = arith.constant 0 : i32
    %c0_i32_0 = arith.constant 0 : i32
    %c0_i32_1 = arith.constant 0 : i32
    return %c0_i32, %c0_i32_0 : i32, i32
  }
  func.func @transform_2(%arg0: i32) -> (i32, i32) {
    %c0_i32 = arith.constant 0 : i32
    %c0_i32_0 = arith.constant 0 : i32
    %c0_i32_1 = arith.constant 0 : i32
    return %c0_i32, %c0_i32_0 : i32, i32
  }
  func.func @transform_3(%arg0: i32) -> (i32, i32) {
    %c0_i32 = arith.constant 0 : i32
    %c0_i32_0 = arith.constant 0 : i32
    %c0_i32_1 = arith.constant 0 : i32
    return %c0_i32, %c0_i32_0 : i32, i32
  }
  func.func @transform_4(%arg0: i32) -> (i32, i32) {
    %c0_i32 = arith.constant 0 : i32
    %c0_i32_0 = arith.constant 0 : i32
    %c0_i32_1 = arith.constant 0 : i32
    return %c0_i32, %c0_i32_0 : i32, i32
  }
  func.func @transform_5(%arg0: i32) -> (i32, i32) {
    %c0_i32 = arith.constant 0 : i32
    %c0_i32_0 = arith.constant 0 : i32
    return %arg0, %c0_i32 : i32, i32
  }
}

</mosaic_0001>

<bundles_post_ra>
// kernel: tpu_custom_call.1
= control target key start
LH: loop header
LB: loop body
LE: loop exit
PB: predicated region body
PF: predicated region fallthrough
CT: control target
= control target key end

     0   :  { %10 = vsyncpa [#allocation3], 0  ;;  %s490_s0 = inlined_call_operand.vmem [shape: f32[16,3], index: 0, kind: input, shape index: {}]   ;;  %s491_s1 = inlined_call_operand.vmem [shape: f32[3,256], index: 1, kind: input, shape index: {}]   ;;  %s492_s2 = inlined_call_operand.vmem [shape: f32[1,256], index: 2, kind: input, shape index: {}]   ;;  %s493_s3 = inlined_call_operand.hbm [shape: f32[256,128], index: 3, kind: input, shape index: {}]   ;;  %s494_s4 = inlined_call_operand.vmem [shape: f32[1,128], index: 4, kind: input, shape index: {}]   ;;  %s495_s5 = inlined_call_operand.hbm [shape: f32[16,128], index: 5, kind: output, shape index: {}]  }
   0x1   :  { %11 = vsyncpa [#allocation4], 0  ;;  %s426_s18 = smov [#allocation2]  }
   0x2   :  { %s23_s19 = sshll.u32 %s426_s18, 4  ;;  %s24_s19 = int_to_ptr.vmem [resolvable:$true] %s23_s19 }
   0x3   :  { %s390_s20 = scalar_lea.vmem %s24_s19, 4096  ;;  %p395_p1 = scmp.lt.s32.totalorder %s24_s19, %s24_s19 }
   0x4   :  { %p391_p0 = scmp.ne.s32.totalorder %s24_s19, %s390_s20  ;;  %p396_p2 = scmp.lt.s32.totalorder %s390_s20, %s390_s20 }
   0x6   :  { %p397_p3 = por %p396_p2, %p395_p1 }
   0x8   :  { %p398_p4 = pnand %p397_p3, %p391_p0 }
   0xa   :  { %401 = shalt.err (!%p398_p4)
}
   0xb   :  { %s427_s21 = smov 128   ;;  %s428_s22 = smov 8  }
   0xc   :  { %29 = dma.hbm_to_vmem [thread:$0]  %s493_s3, 4096, %s24_s19, [#allocation3], %s427_s21, %s427_s21, %s428_s22  }
   0xd   :  { %422 = dma.done.wait [#allocation3], 4096  }
   0xe   :  { %423 = vsyncadd [#allocation3], 4294963200  ;;  %v429_v0 = vmov 1   ;;  %v430_v1 = vmov 0   ;;  %v35_v2 = vld [vmem:[%s490_s0] sm:$0xff]  ;;  %v198_v3 = vld [vmem:[#allocation2 + $0xf8] sm:$0xff]  ;;  %v50_v37 = vlaneseq }
   0xf   :  { %379 = vset.pattern.permute.xlu1 %v429_v0  ;;  %378 = vset.pattern.permute.xlu0 %v430_v1  ;;  %v182_v4 = vld [vmem:[#allocation2 + $0x78] sm:$0xff]  ;;  %v197_v5 = vld [vmem:[#allocation2 + $0xf0] sm:$0xff]  ;;  %v36_v6 = vld [vmem:[%s490_s0 + $0x8] sm:$0xff]  ;;  %v431_v11 = vmov 2   ;;  %s432_s6 = smov [#allocation5]  }
  0x10   :  { %88 = vperm.xlu1 %379, %v35_v2   ;;  %41 = vperm.xlu0 %378, %v35_v2   ;;  %v181_v7 = vld [vmem:[#allocation2 + $0x70] sm:$0xff]  ;;  %v196_v8 = vld [vmem:[#allocation2 + $0xe8] sm:$0xff]  ;;  %v195_v10 = vld [vmem:[#allocation2 + $0xe0] sm:$0xff]  ;;  %v51_v38 = vshrl.u32 %v50_v37, 7  ;;  %s288_s7 = sshll.u32 %s432_s6, 4  ;;  %s289_s7 = int_to_ptr.vmem [resolvable:$true] %s288_s7 }
  0x11   :  { %301 = vmatprep.subr.mxu0 %v198_v3  ;;  %339 = vmatprep.subr.mxu1 %v198_v3  ;;  %v180_v9 = vld [vmem:[#allocation2 + $0x68] sm:$0xff]  ;;  %v179_v12 = vld [vmem:[#allocation2 + $0x60] sm:$0xff]  ;;  %v194_v13 = vld [vmem:[#allocation2 + $0xd8] sm:$0xff]  ;;  %s402_s8 = scalar_lea.vmem %s289_s7, 256  ;;  %p407_p6 = scmp.lt.s32.totalorder %s289_s7, %s289_s7 }
  0x12   :  { %302 = vmatpush3.msra.mxu0 %v182_v4  ;;  %355 = vmatpush3.msra.mxu1 %v182_v4  ;;  %v178_v14 = vld [vmem:[#allocation2 + $0x58] sm:$0xff]  ;;  %v193_v15 = vld [vmem:[#allocation2 + $0xd0] sm:$0xff]  ;;  %v192_v17 = vld [vmem:[#allocation2 + $0xc8] sm:$0xff]  ;;  %v52_v39 = vsub.s32 0, %v51_v38  ;;  %v56_v40 = vsub.s32 4, %v51_v38  ;;  %v79_v44 = vsub.s32 1, %v51_v38  ;;  %p403_p5 = scmp.ne.s32.totalorder %s289_s7, %s402_s8  ;;  %p408_p7 = scmp.lt.s32.totalorder %s402_s8, %s402_s8 }
  0x13   :  { %303 = vmatprep.subr.mxu0 %v197_v5  ;;  %340 = vmatprep.subr.mxu1 %v197_v5  ;;  %v177_v16 = vld [vmem:[#allocation2 + $0x50] sm:$0xff]  ;;  %v176_v18 = vld [vmem:[#allocation2 + $0x48] sm:$0xff]  ;;  %v191_v19 = vld [vmem:[#allocation2 + $0xc0] sm:$0xff]  ;;  %v101_v45 = vsub.s32 5, %v51_v38  ;;  %v131_v51 = vsub.s32 2, %v51_v38  ;;  %v135_v52 = vsub.s32 6, %v51_v38 }
  0x14   :  { %92 = vperm.xlu1 %379, %v36_v6   ;;  %46 = vperm.xlu0 %378, %v36_v6   ;;  %v175_v20 = vld [vmem:[#allocation2 + $0x40] sm:$0xff]  ;;  %v190_v21 = vld [vmem:[#allocation2 + $0xb8] sm:$0xff]  ;;  %v189_v23 = vld [vmem:[#allocation2 + $0xb0] sm:$0xff]  ;;  %p409_p8 = por %p408_p7, %p407_p6 }
  0x15   :  { %304 = vmatpush3.msra.mxu0 %v181_v7  ;;  %356 = vmatpush3.msra.mxu1 %v181_v7  ;;  %v174_v22 = vld [vmem:[#allocation2 + $0x38] sm:$0xff]  ;;  %v173_v24 = vld [vmem:[#allocation2 + $0x30] sm:$0xff]  ;;  %v188_v25 = vld [vmem:[#allocation2 + $0xa8] sm:$0xff] }
  0x16   :  { %305 = vmatprep.subr.mxu0 %v196_v8  ;;  %341 = vmatprep.subr.mxu1 %v196_v8  ;;  %v172_v26 = vld [vmem:[#allocation2 + $0x28] sm:$0xff]  ;;  %v187_v27 = vld [vmem:[#allocation2 + $0xa0] sm:$0xff]  ;;  %v186_v29 = vld [vmem:[#allocation2 + $0x98] sm:$0xff]  ;;  %p410_p9 = pnand %p409_p8, %p403_p5 }
  0x17   :  { %306 = vmatpush3.msra.mxu0 %v180_v9  ;;  %357 = vmatpush3.msra.mxu1 %v180_v9  ;;  %v171_v28 = vld [vmem:[#allocation2 + $0x20] sm:$0xff]  ;;  %v170_v30 = vld [vmem:[#allocation2 + $0x18] sm:$0xff]  ;;  %v185_v31 = vld [vmem:[#allocation2 + $0x90] sm:$0xff] }
  0x18   :  { %381 = vset.pattern.permute.xlu1 %v431_v11  ;;  %380 = vset.pattern.permute.xlu0 %v431_v11  ;;  %v169_v32 = vld [vmem:[#allocation2 + $0x10] sm:$0xff]  ;;  %v184_v33 = vld [vmem:[#allocation2 + $0x88] sm:$0xff]  ;;  %v183_v35 = vld [vmem:[#allocation2 + $0x80] sm:$0xff] }
  0x19   :  { %126 = vperm.xlu1 %381, %v36_v6   ;;  %122 = vperm.xlu0 %380, %v35_v2   ;;  %v168_v34 = vld [vmem:[#allocation2 + $0x8] sm:$0xff]  ;;  %v167_v36 = vld [vmem:[#allocation2] sm:$0xff] }
  0x1a   :  { %307 = vmatprep.subr.mxu0 %v195_v10  ;;  %342 = vmatprep.subr.mxu1 %v195_v10  ;;  %v37_v41 = vld [vmem:[%s491_s1] sm:$0x77] }
  0x1b   :  { %308 = vmatpush3.msra.mxu0 %v179_v12  ;;  %358 = vmatpush3.msra.mxu1 %v179_v12  ;;  %v53_v42 = vrot.slane %v37_v41, %v52_v39  ;;  %v57_v43 = vrot.slane %v37_v41, %v56_v40  ;;  %v98_v48 = vrot.slane %v37_v41, %v79_v44  ;;  %v38_v50 = vld [vmem:[%s492_s2] sm:$0x3] }
  0x1c   :  { %309 = vmatprep.subr.mxu0 %v194_v13  ;;  %343 = vmatprep.subr.mxu1 %v194_v13  ;;  %v102_v49 = vrot.slane %v37_v41, %v101_v45  ;;  %v76_v55 = vrot.slane %v38_v50, %v52_v39  ;;  %v80_v56 = vrot.slane %v38_v50, %v79_v44  ;;  %v300_v37 = vld [vmem:[%s494_s4] ss:$0 sm:$0xff] }
  0x1d   :  { %310 = vmatpush3.msra.mxu0 %v178_v14  ;;  %359 = vmatpush3.msra.mxu1 %v178_v14  ;;  %v63_v46 = vrot.slane %v53_v42, %v52_v39  ;;  %v67_v47 = vrot.slane %v57_v43, %v52_v39  ;;  %v108_v59 = vrot.slane %v98_v48, %v79_v44 }
  0x1e   :  { %311 = vmatprep.subr.mxu0 %v193_v15  ;;  %344 = vmatprep.subr.mxu1 %v193_v15  ;;  %v112_v60 = vrot.slane %v102_v49, %v79_v44  ;;  %v132_v61 = vrot.slane %v37_v41, %v131_v51  ;;  %v136_v62 = vrot.slane %v37_v41, %v135_v52 }
  0x1f   :  { %312 = vmatpush3.msra.mxu0 %v177_v16  ;;  %360 = vmatpush3.msra.mxu1 %v177_v16 }
  0x20   :  { %313 = vmatprep.subr.mxu0 %v192_v17  ;;  %345 = vmatprep.subr.mxu1 %v192_v17  ;;  %v142_v7 = vrot.slane %v132_v61, %v131_v51  ;;  %v146_v8 = vrot.slane %v136_v62, %v131_v51 }
  0x21   :  { %314 = vmatpush3.msra.mxu0 %v176_v18  ;;  %361 = vmatpush3.msra.mxu1 %v176_v18 }
  0x22   :  { %315 = vmatprep.subr.mxu0 %v191_v19  ;;  %346 = vmatprep.subr.mxu1 %v191_v19 }
  0x23   :  { %316 = vmatpush3.msra.mxu0 %v175_v20  ;;  %362 = vmatpush3.msra.mxu1 %v175_v20 }
  0x24   :  { %317 = vmatprep.subr.mxu0 %v190_v21  ;;  %347 = vmatprep.subr.mxu1 %v190_v21 }
  0x25   :  { %318 = vmatpush3.msra.mxu0 %v174_v22  ;;  %363 = vmatpush3.msra.mxu1 %v174_v22 }
  0x26   :  { %319 = vmatprep.subr.mxu0 %v189_v23  ;;  %348 = vmatprep.subr.mxu1 %v189_v23 }
  0x27   :  { %320 = vmatpush3.msra.mxu0 %v173_v24  ;;  %364 = vmatpush3.msra.mxu1 %v173_v24 }
  0x28   :  { %321 = vmatprep.subr.mxu0 %v188_v25  ;;  %349 = vmatprep.subr.mxu1 %v188_v25 }
  0x29   :  { %322 = vmatpush3.msra.mxu0 %v172_v26  ;;  %365 = vmatpush3.msra.mxu1 %v172_v26 }
  0x2a   :  { %323 = vmatprep.subr.mxu0 %v187_v27  ;;  %350 = vmatprep.subr.mxu1 %v187_v27 }
  0x2b   :  { %324 = vmatpush3.msra.mxu0 %v171_v28  ;;  %366 = vmatpush3.msra.mxu1 %v171_v28 }
  0x2c   :  { %325 = vmatprep.subr.mxu0 %v186_v29  ;;  %351 = vmatprep.subr.mxu1 %v186_v29 }
  0x2d   :  { %326 = vmatpush3.msra.mxu0 %v170_v30  ;;  %367 = vmatpush3.msra.mxu1 %v170_v30 }
  0x2e   :  { %327 = vmatprep.subr.mxu0 %v185_v31  ;;  %352 = vmatprep.subr.mxu1 %v185_v31 }
  0x2f   :  { %328 = vmatpush3.msra.mxu0 %v169_v32  ;;  %368 = vmatpush3.msra.mxu1 %v169_v32 }
  0x30   :  { %329 = vmatprep.subr.mxu0 %v184_v33  ;;  %353 = vmatprep.subr.mxu1 %v184_v33 }
  0x31   :  { %330 = vmatpush3.msra.mxu0 %v168_v34  ;;  %369 = vmatpush3.msra.mxu1 %v168_v34 }
  0x32   :  { %331 = vmatprep.subr.mxu0 %v183_v35  ;;  %354 = vmatprep.subr.mxu1 %v183_v35 }
  0x33   :  { %332 = vmatpush3.msra.mxu0 %v167_v36  ;;  %370 = vmatpush3.msra.mxu1 %v167_v36 }
  0x8b   :  { %v89_v53 = vpop.permute.xlu1 %88  ;;  %v42_v54 = vpop.permute.xlu0 %41 }
  0x8c   :  { %v68_v57 = vmul.f32 %v63_v46, %v42_v54  ;;  %v69_v58 = vmul.f32 %v67_v47, %v42_v54  ;;  %v113_v5 = vmul.f32 %v108_v59, %v89_v53  ;;  %v114_v6 = vmul.f32 %v112_v60, %v89_v53 }
  0x8e   :  { %v83_v1 = vadd.f32 %v76_v55, %v68_v57  ;;  %v84_v2 = vadd.f32 %v80_v56, %v69_v58 }
  0x8f   :  { %v93_v63 = vpop.permute.xlu1 %92  ;;  %v47_v0 = vpop.permute.xlu0 %46 }
  0x90   :  { %v70_v3 = vmul.f32 %v63_v46, %v47_v0  ;;  %v71_v4 = vmul.f32 %v67_v47, %v47_v0  ;;  %v115_v9 = vmul.f32 %v108_v59, %v93_v63  ;;  %v116_v10 = vmul.f32 %v112_v60, %v93_v63 }
  0x91   :  { %v117_v16 = vadd.f32 %v113_v5, %v83_v1  ;;  %v118_v17 = vadd.f32 %v114_v6, %v84_v2 }
  0x92   :  { %v85_v11 = vadd.f32 %v76_v55, %v70_v3  ;;  %v86_v12 = vadd.f32 %v80_v56, %v71_v4 }
  0x94   :  { %v127_v13 = vpop.permute.xlu1 %126  ;;  %v119_v14 = vadd.f32 %v115_v9, %v85_v11  ;;  %v120_v15 = vadd.f32 %v116_v10, %v86_v12  ;;  %v123_v18 = vpop.permute.xlu0 %122 }
  0x95   :  { %v149_v19 = vmul.f32 %v142_v7, %v127_v13  ;;  %v150_v20 = vmul.f32 %v146_v8, %v127_v13  ;;  %v147_v21 = vmul.f32 %v142_v7, %v123_v18  ;;  %v148_v22 = vmul.f32 %v146_v8, %v123_v18 }
  0x97   :  { %v153_v23 = vadd.f32 %v149_v19, %v119_v14  ;;  %v154_v24 = vadd.f32 %v150_v20, %v120_v15  ;;  %v151_v25 = vadd.f32 %v147_v21, %v117_v16  ;;  %v152_v26 = vadd.f32 %v148_v22, %v118_v17 }
  0x99   :  { %vm156_vm0 = vcmp.gt.f32.partialorder %v152_v26, 0.0  ;;  %v160_v27 = vmul.f32 0.01, %v152_v26  ;;  %vm158_vm1 = vcmp.gt.f32.partialorder %v154_v24, 0.0  ;;  %v162_v28 = vmul.f32 0.01, %v154_v24 }
  0x9a   :  { %vm155_vm2 = vcmp.gt.f32.partialorder %v151_v25, 0.0  ;;  %v159_v29 = vmul.f32 0.01, %v151_v25  ;;  %vm157_vm3 = vcmp.gt.f32.partialorder %v153_v23, 0.0  ;;  %v161_v30 = vmul.f32 0.01, %v153_v23 }
  0x9b   :  { %v164_v31 = vsel %vm156_vm0, %v152_v26, %v160_v27  ;;  %v166_v32 = vsel %vm158_vm1, %v154_v24, %v162_v28 }
  0x9c   :  { %270 = vmatprep.mubr.f32.mxu0 %v164_v31  ;;  %275 = vmatprep.mubr.f32.mxu1 %v166_v32  ;;  %v163_v33 = vsel %vm155_vm2, %v151_v25, %v159_v29  ;;  %v165_v34 = vsel %vm157_vm3, %v153_v23, %v161_v30 }
  0x9d   :  { %271 = vmatmul.mubr.f32.vlgmr.msra.gmra.mxu0 %v163_v33  ;;  %276 = vmatmul.mubr.f32.vlgmr.msra.gmra.mxu1 %v165_v34 }
 0x15d   :  { %v333_v35 = vpop.f32.mrf.mxu0  ;;  %v336_v36 = vpop.f32.mrf.mxu1 }
 0x15f   :  { %v334_v38 = vpop.f32.mrf.mxu0  ;;  %v337_v39 = vpop.f32.mrf.mxu1 }
 0x160   :  { %v335_v40 = vadd.f32 %v334_v38, %v333_v35  ;;  %v338_v41 = vadd.f32 %v337_v39, %v336_v36 }
 0x162   :  { %v273_v42 = vadd.f32 %v335_v40, %v300_v37  ;;  %v278_v43 = vadd.f32 %v338_v41, %v300_v37 }
 0x164   :  { %281 = vst [vmem:[#allocation5] sm:$0xff] %v273_v42  ;;  %282 = vst [vmem:[#allocation5 + $0x8] sm:$0xff] %v278_v43 }
 0x165   :  { %413 = shalt.err (!%p410_p9)
}
 0x166   :  { %294 = dma.vmem_to_hbm [thread:$0]  %s289_s7, 256, %s495_s5, [#allocation4], %s427_s21, %s427_s21, %s428_s22  }
 0x167   :  { %424 = dma.done.wait [#allocation4], 256  }
 0x168   :  { %425 = vsyncadd [#allocation4], 4294967040 }
 0x169   :  { %298 = vsyncpa [#allocation3], 1 }
 0x16a   :  { %299 = vsyncpa [#allocation4], 1 }

</bundles_post_ra>
